<compile_context>
chip_gen: v5e
topology: v5e:2x2
jax: 0.10.0
libtpu: 0.0.40
codegen_flags: <defaults>
</compile_context>

<pallas_src>
import functools
import math

import jax
import jax.numpy as jnp
from jax.experimental import pallas as pl
from jax.experimental.pallas import tpu as pltpu

_LANE = 128


def _focal_loss_kernel(x_ref, t_ref, out_ref, acc_ref, *,
                       gamma, blocks_per_shard, last_block,
                       tile_rows, acc_rows, last_full_rows, last_rem_lanes,
                       need_mask):
    p = pl.program_id(0)                 # shard (parallel across TCs on v7x)
    j = pl.program_id(1)                 # row-block within shard (reduction axis)
    g = p * blocks_per_shard + j         # global row-block index

    @pl.when(j == 0)
    def _init():
        acc_ref[...] = jnp.zeros_like(acc_ref)

    x = x_ref[...].astype(jnp.float32)
    t = t_ref[...].astype(jnp.float32)

    # Numerically-stable BCE with logits (torch's formulation):
    #   bce = max(x, 0) - x*t + log(1 + exp(-|x|))
    bce = jnp.maximum(x, 0.0) - x * t + jnp.log1p(jnp.exp(-jnp.abs(x)))
    pt = jnp.exp(-bce)
    one_minus_pt = 1.0 - pt

    # (1 - pt)**gamma: integer gamma -> repeated multiplies (no extra exp/log,
    # no log(0) NaN risk when pt == 1). Non-integer gamma -> clamped pow; the
    # 1e-30 clamp turns an exact 0 into ~1e-30**gamma (negligible for the mean).
    g_is_int = float(gamma) == int(gamma) and int(gamma) >= 0
    if g_is_int:
        gi = int(gamma)
        if gi == 0:
            w = jnp.ones_like(one_minus_pt)
        else:
            w = one_minus_pt
            for _ in range(gi - 1):
                w = w * one_minus_pt
    else:
        w = jnp.power(jnp.maximum(one_minus_pt, 1e-30), gamma)

    focal = w * bce  # alpha and 1/N are applied once, in the wrapper.

    n_groups = tile_rows // acc_rows

    def fold(f):
        # (tile_rows, 128) -> (acc_rows, 128) with plain, tile-aligned VALU adds.
        part = f[0:acc_rows, :]
        for k in range(1, n_groups):
            part = part + f[k * acc_rows:(k + 1) * acc_rows, :]
        return part

    if need_mask:
        # Steady state: unmasked accumulate (mask cost only paid on the last block).
        @pl.when(g < last_block)
        def _steady():
            acc_ref[...] += fold(focal)

        # Last (partially valid) block: mask with in-block row/lane ids — small
        # static ints, no flat-index int32 overflow for huge arrays.
        @pl.when(g == last_block)
        def _last():
            row = jax.lax.broadcasted_iota(jnp.int32, (tile_rows, _LANE), 0)
            valid = row < last_full_rows
            if last_rem_lanes > 0:
                lane = jax.lax.broadcasted_iota(jnp.int32, (tile_rows, _LANE), 1)
                valid = valid | ((row == last_full_rows) & (lane < last_rem_lanes))
            acc_ref[...] += fold(jnp.where(valid, focal, 0.0))
        # g > last_block (fully out-of-bounds filler step of an uneven shard): skip.
    else:
        @pl.when(g <= last_block)
        def _steady():
            acc_ref[...] += fold(focal)

    @pl.when(j == blocks_per_shard - 1)
    def _finalize():
        # One cross-lane reduce per shard (epilogue only, never in the hot loop).
        out_ref[...] = jnp.sum(acc_ref[...], dtype=jnp.float32).reshape(1, 1, 1)


def focal_loss(inputs, targets, alpha=1.0, gamma=2.0, *,
               max_tile_rows=4096, num_shards=2):
    """Pallas TPU focal loss (mean reduction). Accepts float arrays of any shape."""
    assert inputs.shape == targets.shape
    n_total = math.prod(inputs.shape)
    assert n_total > 0

    x = inputs.reshape(-1)
    t = targets.reshape(-1)

    rem_lanes = n_total % _LANE
    if rem_lanes:
        # At most 127 padded elements; allow_input_fusion lets XLA fold this into
        # the pallas_call input instead of materializing a full copy. Pad values
        # are masked out in-kernel.
        pad = _LANE - rem_lanes
        x = jnp.pad(x, (0, pad))
        t = jnp.pad(t, (0, pad))
    rows = x.shape[0] // _LANE
    # Pure metadata reshape (contiguous row-major data).
    x = x.reshape(rows, _LANE)
    t = t.reshape(rows, _LANE)

    # Row tiling: 4096-row blocks (2 MiB / input @ f32); 2 inputs double-buffered
    # + (256,128) accumulator ≈ 8.1 MiB — under every scoped-VMEM default
    # (v5e 16 MiB, v6e/v7x 32 MiB).
    if rows <= max_tile_rows:
        tile_rows = rows            # single full-dim block — always a legal block
        acc_rows = rows             # one step: fold is a no-op
    else:
        tile_rows = max(256, (int(max_tile_rows) // 256) * 256)
        acc_rows = 256

    nblocks = pl.cdiv(rows, tile_rows)
    shards = max(1, min(int(num_shards), nblocks))   # 2 -> both TCs on v7x
    bps = pl.cdiv(nblocks, shards)                    # row-blocks per shard
    last_block = nblocks - 1

    full_rows_valid = n_total // _LANE
    rem_lanes = n_total % _LANE
    last_full_rows = full_rows_valid - last_block * tile_rows
    need_mask = not (last_full_rows == tile_rows and rem_lanes == 0)

    def in_map(p, j):
        # Clamp filler steps of an uneven shard onto the last real block
        # (their contribution is skipped inside the kernel).
        return (jnp.minimum(p * bps + j, last_block), 0)

    kernel = functools.partial(
        _focal_loss_kernel,
        gamma=float(gamma),
        blocks_per_shard=bps,
        last_block=last_block,
        tile_rows=tile_rows,
        acc_rows=acc_rows,
        last_full_rows=last_full_rows,
        last_rem_lanes=rem_lanes,
        need_mask=need_mask,
    )

    cost = pl.CostEstimate(
        flops=10 * n_total,
        transcendentals=3 * n_total,
        bytes_accessed=2 * inputs.dtype.itemsize * n_total + 4 * shards,
    )

    partials = pl.pallas_call(
        kernel,
        out_shape=jax.ShapeDtypeStruct((shards, 1, 1), jnp.float32),
        grid=(shards, bps),
        in_specs=[
            pl.BlockSpec((tile_rows, _LANE), in_map),
            pl.BlockSpec((tile_rows, _LANE), in_map),
        ],
        out_specs=pl.BlockSpec((1, 1, 1), lambda p, j: (p, 0, 0)),
        scratch_shapes=[pltpu.VMEM((acc_rows, _LANE), jnp.float32)],
        compiler_params=pltpu.CompilerParams(
            dimension_semantics=("parallel", "arbitrary"),
            allow_input_fusion=[True, True],
        ),
        cost_estimate=cost,
    )(x, t)

    return jnp.sum(partials) * (float(alpha) / float(n_total))


def _focal_loss_ref(inputs, targets, alpha=1.0, gamma=2.0):
    x = inputs.astype(jnp.float32)
    t = targets.astype(jnp.float32)
    bce = jnp.maximum(x, 0.0) - x * t + jnp.log1p(jnp.exp(-jnp.abs(x)))
    pt = jnp.exp(-bce)
    return jnp.mean(alpha * (1.0 - pt) ** gamma * bce)


if __name__ == "__main__":
    fl = jax.jit(focal_loss,
                 static_argnames=("alpha", "gamma", "max_tile_rows", "num_shards"))

    key = jax.random.PRNGKey(0)
    k1, k2, k3, k4 = jax.random.split(key, 4)

    # 1) Lane-aligned fast path (no pad, single block): 16 x 256 logits/targets.
    logits = jax.random.normal(k1, (16, 256), dtype=jnp.float32) * 2.0
    targets = jax.random.bernoulli(k2, 0.5, (16, 256)).astype(jnp.float32)
    loss = jax.block_until_ready(fl(logits, targets, alpha=1.0, gamma=2.0))
    ref = _focal_loss_ref(logits, targets, alpha=1.0, gamma=2.0)
    assert jnp.allclose(loss, ref, rtol=1e-4, atol=1e-6), (loss, ref)

    # 2) Non-multiple-of-128 element count (pad + last-step mask).
    logits2 = jax.random.normal(k3, (37, 100), dtype=jnp.float32)
    targets2 = jax.random.bernoulli(k4, 0.3, (37, 100)).astype(jnp.float32)
    loss2 = jax.block_until_ready(fl(logits2, targets2, alpha=0.25, gamma=2.0))
    ref2 = _focal_loss_ref(logits2, targets2, alpha=0.25, gamma=2.0)
    assert jnp.allclose(loss2, ref2, rtol=1e-4, atol=1e-6), (loss2, ref2)

    # 3) bf16 inputs, multi-block grid with 2 shards + in-block fold (small tiles
    #    forced via max_tile_rows just to exercise the steady-state path).
    k5, k6 = jax.random.split(k3)
    logits3 = (jax.random.normal(k5, (512, 256), dtype=jnp.float32) * 2.0).astype(jnp.bfloat16)
    targets3 = jax.random.bernoulli(k6, 0.4, (512, 256)).astype(jnp.bfloat16)
    loss3 = jax.block_until_ready(
        fl(logits3, targets3, alpha=0.5, gamma=2.0, max_tile_rows=512, num_shards=2))
    ref3 = _focal_loss_ref(logits3, targets3, alpha=0.5, gamma=2.0)
    assert jnp.allclose(loss3, ref3, rtol=1e-4, atol=1e-6), (loss3, ref3)

    # 4) Non-integer gamma (pow path).
    loss4 = jax.block_until_ready(fl(logits, targets, alpha=1.0, gamma=1.5))
    ref4 = _focal_loss_ref(logits, targets, alpha=1.0, gamma=1.5)
    assert jnp.allclose(loss4, ref4, rtol=1e-4, atol=1e-6), (loss4, ref4)

    print("KERNEL_OK")
</pallas_src>

<mosaic_0001>
module attributes {stable_mosaic.version = 11 : i64} {
  func.func @_focal_loss_kernel(%arg0: i32, %arg1: i32, %arg2: memref<32x128xf32, #tpu.memory_space<vmem>>, %arg3: memref<32x128xf32, #tpu.memory_space<vmem>>, %arg4: memref<1x1x1xf32, #tpu.memory_space<vmem>>, %arg5: memref<32x128xf32, #tpu.memory_space<vmem>>) attributes {dimension_semantics = [#tpu.dimension_semantics<parallel>, #tpu.dimension_semantics<arbitrary>], iteration_bounds = array<i64: 1, 1>, scalar_prefetch = 0 : i64, scratch_operands = 1 : i64, tpu.core_type = #tpu.core_type<tc>, window_params = [{transform_indices = @transform_0, window_bounds = array<i64: 32, 128>}, {transform_indices = @transform_1, window_bounds = array<i64: 32, 128>}, {transform_indices = @transform_2, window_bounds = array<i64: 1, 1, 1>}]} {
    %c1_i32 = arith.constant 1 : i32
    %0 = arith.muli %arg0, %c1_i32 : i32
    %1 = arith.addi %0, %arg1 : i32
    %c0_i32 = arith.constant 0 : i32
    %2 = arith.cmpi eq, %arg1, %c0_i32 : i32
    %3 = arith.extui %2 : i1 to i32
    %c0_i32_0 = arith.constant 0 : i32
    %4 = arith.cmpi ne, %3, %c0_i32_0 : i32
    scf.if %4 {
      %cst_11 = arith.constant 0.000000e+00 : f32
      %30 = vector.broadcast %cst_11 : f32 to vector<32x128xf32>
      %c0_12 = arith.constant 0 : index
      %c0_13 = arith.constant 0 : index
      %31 = vector.load %arg5[%c0_12, %c0_13] : memref<32x128xf32, #tpu.memory_space<vmem>>, vector<32x128xf32>
      tpu.vector_store %arg5[%c0_12, %c0_13], %30 {strides = array<i32>} : memref<32x128xf32, #tpu.memory_space<vmem>>, vector<32x128xf32>,
    } else {
    }
    %c0 = arith.constant 0 : index
    %c0_1 = arith.constant 0 : index
    %5 = vector.load %arg2[%c0, %c0_1] : memref<32x128xf32, #tpu.memory_space<vmem>>, vector<32x128xf32>
    %c0_2 = arith.constant 0 : index
    %c0_3 = arith.constant 0 : index
    %6 = vector.load %arg3[%c0_2, %c0_3] : memref<32x128xf32, #tpu.memory_space<vmem>>, vector<32x128xf32>
    %cst = arith.constant 0.000000e+00 : f32
    %7 = vector.broadcast %cst : f32 to vector<32x128xf32>
    %8 = arith.maximumf %5, %7 : vector<32x128xf32>
    %9 = arith.mulf %5, %6 : vector<32x128xf32>
    %10 = arith.subf %8, %9 : vector<32x128xf32>
    %11 = math.absf %5 : vector<32x128xf32>
    %cst_4 = arith.constant 0.000000e+00 : f32
    %12 = vector.broadcast %cst_4 : f32 to vector<32x128xf32>
    %13 = arith.subf %12, %11 : vector<32x128xf32>
    %14 = math.exp %13 : vector<32x128xf32>
    %15 = math.log1p %14 : vector<32x128xf32>
    %16 = arith.addf %10, %15 : vector<32x128xf32>
    %cst_5 = arith.constant 0.000000e+00 : f32
    %17 = vector.broadcast %cst_5 : f32 to vector<32x128xf32>
    %18 = arith.subf %17, %16 : vector<32x128xf32>
    %19 = math.exp %18 : vector<32x128xf32>
    %cst_6 = arith.constant 1.000000e+00 : f32
    %20 = vector.broadcast %cst_6 : f32 to vector<32x128xf32>
    %21 = arith.subf %20, %19 : vector<32x128xf32>
    %22 = arith.mulf %21, %21 : vector<32x128xf32>
    %23 = arith.mulf %22, %16 : vector<32x128xf32>
    %c0_i32_7 = arith.constant 0 : i32
    %24 = arith.cmpi sle, %1, %c0_i32_7 : i32
    %25 = arith.extui %24 : i1 to i32
    %c0_i32_8 = arith.constant 0 : i32
    %26 = arith.cmpi ne, %25, %c0_i32_8 : i32
    scf.if %26 {
      %c0_11 = arith.constant 0 : index
      %c0_12 = arith.constant 0 : index
      %30 = vector.load %arg5[%c0_11, %c0_12] : memref<32x128xf32, #tpu.memory_space<vmem>>, vector<32x128xf32>
      %31 = arith.addf %30, %23 : vector<32x128xf32>
      %c0_13 = arith.constant 0 : index
      %c0_14 = arith.constant 0 : index
      %32 = vector.load %arg5[%c0_13, %c0_14] : memref<32x128xf32, #tpu.memory_space<vmem>>, vector<32x128xf32>
      tpu.vector_store %arg5[%c0_13, %c0_14], %31 {strides = array<i32>} : memref<32x128xf32, #tpu.memory_space<vmem>>, vector<32x128xf32>,
    } else {
    }
    %c0_i32_9 = arith.constant 0 : i32
    %27 = arith.cmpi eq, %arg1, %c0_i32_9 : i32
    %28 = arith.extui %27 : i1 to i32
    %c0_i32_10 = arith.constant 0 : i32
    %29 = arith.cmpi ne, %28, %c0_i32_10 : i32
    scf.if %29 {
      %c0_11 = arith.constant 0 : index
      %c0_12 = arith.constant 0 : index
      %30 = vector.load %arg5[%c0_11, %c0_12] : memref<32x128xf32, #tpu.memory_space<vmem>>, vector<32x128xf32>
      %31 = vector.shape_cast %30 : vector<32x128xf32> to vector<1x32x128xf32>
      %cst_13 = arith.constant dense<0.000000e+00> : vector<1xf32>
      %32 = vector.multi_reduction <add>, %31, %cst_13 [1, 2] : vector<1x32x128xf32> to vector<1xf32>
      %33 = vector.shape_cast %32 : vector<1xf32> to vector<1x1x1xf32>
      %34 = vector.extract %33[0, 0, 0] : f32 from vector<1x1x1xf32>
      %35 = vector.broadcast %34 : f32 to vector<1x1x1xf32>
      %c0_14 = arith.constant 0 : index
      %c0_15 = arith.constant 0 : index
      %c0_16 = arith.constant 0 : index
      %36 = vector.load %arg4[%c0_14, %c0_15, %c0_16] : memref<1x1x1xf32, #tpu.memory_space<vmem>>, vector<1x1x1xf32>
      tpu.vector_store %arg4[%c0_14, %c0_15, %c0_16], %35 {strides = array<i32>} : memref<1x1x1xf32, #tpu.memory_space<vmem>>, vector<1x1x1xf32>,
    } else {
    }
    return
  }
  func.func @transform_0(%arg0: i32, %arg1: i32) -> (i32, i32) {
    %c1_i32 = arith.constant 1 : i32
    %0 = arith.muli %arg0, %c1_i32 : i32
    %1 = arith.addi %0, %arg1 : i32
    %c0_i32 = arith.constant 0 : i32
    %2 = arith.minsi %1, %c0_i32 : i32
    %c0_i32_0 = arith.constant 0 : i32
    %c0_i32_1 = arith.constant 0 : i32
    return %2, %c0_i32_0 : i32, i32
  }
  func.func @transform_1(%arg0: i32, %arg1: i32) -> (i32, i32) {
    %c1_i32 = arith.constant 1 : i32
    %0 = arith.muli %arg0, %c1_i32 : i32
    %1 = arith.addi %0, %arg1 : i32
    %c0_i32 = arith.constant 0 : i32
    %2 = arith.minsi %1, %c0_i32 : i32
    %c0_i32_0 = arith.constant 0 : i32
    %c0_i32_1 = arith.constant 0 : i32
    return %2, %c0_i32_0 : i32, i32
  }
  func.func @transform_2(%arg0: i32, %arg1: i32) -> (i32, i32, i32) {
    %c0_i32 = arith.constant 0 : i32
    %c0_i32_0 = arith.constant 0 : i32
    %c0_i32_1 = arith.constant 0 : i32
    return %arg0, %c0_i32, %c0_i32_0 : i32, i32, i32
  }
}

</mosaic_0001>

<bundles_post_ra>
// kernel: focal_loss.1
= control target key start
LH: loop header
LB: loop body
LE: loop exit
PB: predicated region body
PF: predicated region fallthrough
CT: control target
= control target key end

     0   :  { %s374_s0 = inlined_call_operand.vmem [shape: f32[32,128], index: 0, kind: input, shape index: {}]   ;;  %s375_s1 = inlined_call_operand.vmem [shape: f32[32,128], index: 1, kind: input, shape index: {}]   ;;  %s376_s2 = inlined_call_operand.hbm [shape: f32[1,1,1], index: 2, kind: output, shape index: {}]  }
   0x1   :  { %v85_v0 = vld [vmem:[%s374_s0] sm:$0xff]  ;;  %v326_v1 = vld [vmem:[%s374_s0 + $0x8] sm:$0xff]  ;;  %v331_v2 = vld [vmem:[%s374_s0 + $0x10] sm:$0xff] }
   0x2   :  { %v336_v3 = vld [vmem:[%s374_s0 + $0x18] sm:$0xff]  ;;  %v105_v4 = vand.u32 2147483647, %v85_v0  ;;  %v106_v5 = vand.u32 2147483647, %v326_v1 }
   0x3   :  { %v107_v6 = vand.u32 2147483647, %v331_v2 }
   0x4   :  { %7 = vsyncpa [#allocation4], 0  ;;  %v108_v7 = vand.u32 2147483647, %v336_v3  ;;  %v109_v8 = vsub.f32 0.0, %v105_v4  ;;  %v110_v9 = vsub.f32 0.0, %v106_v5 }
   0x5   :  { %v111_v10 = vsub.f32 0.0, %v107_v6  ;;  %v89_v18 = vld [vmem:[%s375_s1] sm:$0xff]  ;;  %v90_v25 = vld [vmem:[%s375_s1 + $0x8] sm:$0xff]  ;;  %v93_v26 = vmax.f32 %v85_v0, 0.0  ;;  %v94_v27 = vmax.f32 %v326_v1, 0.0  ;;  %v91_v29 = vld [vmem:[%s375_s1 + $0x10] sm:$0xff] }
   0x6   :  { %v112_v11 = vsub.f32 0.0, %v108_v7  ;;  %v113_v12 = vmul.f32 1.442695, %v109_v8  ;;  %v115_v13 = vmul.f32 1.442695, %v110_v9  ;;  %v97_v30 = vmul.f32 %v89_v18, %v85_v0  ;;  %v92_v33 = vld [vmem:[%s375_s1 + $0x18] sm:$0xff] }
   0x7   :  { %v117_v14 = vmul.f32 1.442695, %v111_v10  ;;  %v98_v37 = vmul.f32 %v90_v25, %v326_v1  ;;  %v95_v41 = vmax.f32 %v331_v2, 0.0  ;;  %v99_v42 = vmul.f32 %v91_v29, %v331_v2  ;;  %s304_s1 = smov [#allocation3]   ;;  %s230_s27 = sshll.u32 %s376_s2, 4  ;;  %s231_s27 = int_to_ptr.hbm [resolvable:$true] %s230_s27 }
   0x8   :  { %254 = vpow2.f32 %v113_v12  ;;  %v119_v15 = vmul.f32 1.442695, %v112_v11  ;;  %v96_v44 = vmax.f32 %v336_v3, 0.0  ;;  %v100_v45 = vmul.f32 %v92_v33, %v336_v3  ;;  %s228_s24 = sshll.u32 %s304_s1, 4  ;;  %s229_s24 = int_to_ptr.vmem [resolvable:$true] %s228_s24 }
   0x9   :  { %256 = vpow2.f32 %v115_v13  ;;  %v101_v49 = vsub.f32 %v93_v26, %v97_v30  ;;  %v102_v54 = vsub.f32 %v94_v27, %v98_v37  ;;  %v103_v59 = vsub.f32 %v95_v41, %v99_v42 }
   0xa   :  { %258 = vpow2.f32 %v117_v14  ;;  %v104_v1 = vsub.f32 %v96_v44, %v100_v45  ;;  %vm221_vm4 = vcmask 0  }
   0xb   :  { %260 = vpow2.f32 %v119_v15 }
   0xe   :  { %v255_v16 = vpop.eup %254 }
   0xf   :  { %v257_v17 = vpop.eup %256  ;;  %v121_v19 = vadd.f32 1.0, %v255_v16  ;;  %v124_v20 = vmul.f32 -0.5, %v255_v16  ;;  %v127_v34 = vand.u32 2147483647, %v255_v16 }
  0x10   :  { %v259_v21 = vpop.eup %258  ;;  %v130_v22 = vadd.f32 1.0, %v257_v17  ;;  %v133_v23 = vmul.f32 -0.5, %v257_v17  ;;  %v136_v38 = vand.u32 2147483647, %v257_v17 }
  0x11   :  { %v261_v24 = vpop.eup %260  ;;  %262 = vlog2.f32 %v121_v19  ;;  %v139_v28 = vadd.f32 1.0, %v259_v21  ;;  %v125_v31 = vadd.f32 1.0, %v124_v20  ;;  %v142_v32 = vmul.f32 -0.5, %v259_v21 }
  0x12   :  { %264 = vlog2.f32 %v130_v22  ;;  %v134_v35 = vadd.f32 1.0, %v133_v23  ;;  %v148_v36 = vadd.f32 1.0, %v261_v24  ;;  %v151_v40 = vmul.f32 -0.5, %v261_v24 }
  0x13   :  { %266 = vlog2.f32 %v139_v28  ;;  %v143_v39 = vadd.f32 1.0, %v142_v32  ;;  %v145_v43 = vand.u32 2147483647, %v259_v21  ;;  %v126_v46 = vmul.f32 %v255_v16, %v125_v31 }
  0x14   :  { %268 = vlog2.f32 %v148_v36  ;;  %v152_v47 = vadd.f32 1.0, %v151_v40  ;;  %vm359_vm0 = vcmp.lt.f32.partialorder %v127_v34, 0.0004427343  ;;  %v135_v51 = vmul.f32 %v257_v17, %v134_v35 }
  0x15   :  { %v154_v52 = vand.u32 2147483647, %v261_v24  ;;  %vm363_vm1 = vcmp.lt.f32.partialorder %v136_v38, 0.0004427343  ;;  %v144_v57 = vmul.f32 %v259_v21, %v143_v39  ;;  %vm146_vm2 = vcmp.lt.f32.partialorder %v145_v43, 0.0004427343 }
  0x16   :  { %v153_v63 = vmul.f32 %v261_v24, %v152_v47 }
  0x17   :  { %v263_v48 = vpop.eup %262  ;;  %vm155_vm3 = vcmp.lt.f32.partialorder %v154_v52, 0.0004427343 }
  0x18   :  { %v265_v53 = vpop.eup %264  ;;  %v123_v55 = vmul.f32 0.6931472, %v263_v48 }
  0x19   :  { %v267_v58 = vpop.eup %266  ;;  %v132_v60 = vmul.f32 0.6931472, %v265_v53 }
  0x1a   :  { %v129_v61 = vsel %vm359_vm0, %v126_v46, %v123_v55  ;;  %v141_v62 = vmul.f32 0.6931472, %v267_v58  ;;  %v269_v0 = vpop.eup %268 }
  0x1b   :  { %v138_v2 = vsel %vm363_vm1, %v135_v51, %v132_v60  ;;  %v157_v3 = vadd.f32 %v129_v61, %v101_v49  ;;  %v150_v5 = vmul.f32 0.6931472, %v269_v0 }
  0x1c   :  { %v147_v4 = vsel %vm146_vm2, %v144_v57, %v141_v62  ;;  %v158_v6 = vadd.f32 %v138_v2, %v102_v54 }
  0x1d   :  { %v159_v7 = vadd.f32 %v147_v4, %v103_v59  ;;  %v161_v8 = vsub.f32 0.0, %v157_v3  ;;  %v156_v9 = vsel %vm155_vm3, %v153_v63, %v150_v5 }
  0x1e   :  { %v162_v10 = vsub.f32 0.0, %v158_v6  ;;  %v160_v11 = vadd.f32 %v156_v9, %v104_v1 }
  0x1f   :  { %v163_v12 = vsub.f32 0.0, %v159_v7  ;;  %v165_v13 = vmul.f32 1.442695, %v161_v8 }
  0x20   :  { %v167_v14 = vmul.f32 1.442695, %v162_v10  ;;  %v164_v15 = vsub.f32 0.0, %v160_v11 }
  0x21   :  { %270 = vpow2.f32 %v165_v13  ;;  %v169_v16 = vmul.f32 1.442695, %v163_v12 }
  0x22   :  { %272 = vpow2.f32 %v167_v14  ;;  %v171_v17 = vmul.f32 1.442695, %v164_v15 }
  0x23   :  { %274 = vpow2.f32 %v169_v16 }
  0x24   :  { %276 = vpow2.f32 %v171_v17 }
  0x27   :  { %v271_v18 = vpop.eup %270 }
  0x28   :  { %v273_v19 = vpop.eup %272  ;;  %v173_v20 = vsub.f32 1.0, %v271_v18 }
  0x29   :  { %v275_v21 = vpop.eup %274  ;;  %v174_v22 = vsub.f32 1.0, %v273_v19 }
  0x2a   :  { %v175_v23 = vsub.f32 1.0, %v275_v21  ;;  %v177_v24 = vmul.f32 %v173_v20, %v173_v20  ;;  %v277_v25 = vpop.eup %276 }
  0x2b   :  { %v178_v26 = vmul.f32 %v174_v22, %v174_v22  ;;  %v176_v27 = vsub.f32 1.0, %v277_v25 }
  0x2c   :  { %v179_v28 = vmul.f32 %v175_v23, %v175_v23  ;;  %v181_v29 = vmul.f32 %v177_v24, %v157_v3 }
  0x2d   :  { %v182_v30 = vmul.f32 %v178_v26, %v158_v6  ;;  %v180_v31 = vmul.f32 %v176_v27, %v176_v27 }
  0x2e   :  { %v183_v32 = vmul.f32 %v179_v28, %v159_v7 }
  0x2f   :  { %v208_v33 = vadd.f32 %v182_v30, %v181_v29  ;;  %v184_v34 = vmul.f32 %v180_v31, %v160_v11 }
  0x31   :  { %v209_v35 = vadd.f32 %v208_v33, %v183_v32 }
  0x33   :  { %v210_v36 = vadd.f32 %v209_v35, %v184_v34 }
  0x35   :  { %211 = vadd.xlane.f32.xlu0 %v210_v36 }
  0xa8   :  { %v212_v37 = vpop.xlane.xlu0 %211 }
  0xa9   :  { %v213_v38 = vrot.slane %v212_v37, 4 }
  0xab   :  { %v214_v39 = vadd.f32 %v213_v38, %v212_v37 }
  0xad   :  { %v215_v40 = vrot.slane %v214_v39, 2 }
  0xaf   :  { %v216_v41 = vadd.f32 %v215_v40, %v214_v39 }
  0xb1   :  { %v217_v42 = vrot.slane %v216_v41, 1 }
  0xb3   :  { %v218_v43 = vadd.f32 %v217_v42, %v216_v41 }
  0xb5   :  { %251 = vpush %v218_v43 }
  0xe6   :  { %s252_s28 = spop %251 }
  0xe7   :  { %v220_v44 = vstv %s252_s28 }
  0xe8   :  { %222 = vst.msk [vmem:[#allocation3] sm:$0x1] %vm221_vm4, %v220_v44 }
  0xe9   :  { %233 = dma.vmem_to_hbm [thread:$0]  %s229_s24, 16, %s231_s27, [#allocation4]  }
  0xea   :  { %302 = dma.done.wait [#allocation4], 16  }
  0xeb   :  { %303 = vsyncadd [#allocation4], 4294967280 }
  0xec   :  { %238 = vsyncpa [#allocation4], 1 }

</bundles_post_ra>
